<compile_context>
chip_gen: v7x
topology: tpu7x:2x2x1
jax: 0.10.0
libtpu: 0.0.40
codegen_flags: <defaults>
</compile_context>

<pallas_src>
import jax
import jax.numpy as jnp
import numpy as np
from jax import lax
from jax.experimental import pallas as pl
from jax.experimental.pallas import tpu as pltpu  # noqa: F401  (TPU backend)

N = 2
C = 4            # in channels
H = 4            # input height == conv1 kernel height -> conv1 out height = 1
W = 30           # window_size
F = 8            # nb_filter
KH, KW1 = 4, 10  # layer1 kernel (4, 10)
KW2 = 10         # layer2 kernel (1, 10)
POOL = 3         # pool (1, 3), stride (1, 1)
HIDDEN = 32
NUM_CLASSES = 2

# per-sample widths
WO1 = W - KW1 + 1          # 21  conv1 out width
WP1 = WO1 - POOL + 1       # 19  pool1 out width
WO2 = WP1 - KW2 + 1        # 10  conv2 out width
WP2 = WO2 - POOL + 1       # 8   pool2 out width == maxpool2_size
FC1_IN = F * WP2           # 64  fc1 in_features

# batch-concatenated ("wide") widths: sample n's valid columns start at n*W.
WCAT = N * W               # 60
WO1C = WCAT - KW1 + 1      # 51
WP1C = WO1C - POOL + 1     # 49
WO2C = WP1C - KW2 + 1      # 40
WP2C = WO2C - POOL + 1     # 38
SPAN = (N - 1) * W + 1     # 31  width so that column n*W survives all fc1 taps

# ---- compile-time validity of the batch-in-lanes trick --------------------
# Receptive-field span of one final output column back to the input slab must
# stay within one sample's W columns, or sample n would read sample n+1's data.
_RF_SPAN = (KW1 - 1) + (POOL - 1) + (KW2 - 1) + (POOL - 1) + (WP2 - 1)  # 29
assert _RF_SPAN <= W - 1, "wide-slab trick invalid: receptive field crosses samples"
assert N * W <= 128, "batch-in-lanes packing assumes N*W fits one vreg lane span"

# ---- packed-parameter slab layout (bias folded as last column) ------------
COL_W1 = KW1 * C * KH + 1        # 161
COL_W2 = KW2 * F + 1             # 81
COL_FC1 = WP2 * F + 1            # 65
COL_FC2 = HIDDEN + 1             # 33
ROW_W1 = 0
ROW_W2 = ROW_W1 + F              # 8
ROW_FC1 = ROW_W2 + F             # 16
ROW_FC2 = ROW_FC1 + HIDDEN       # 48
ROWS = ROW_FC2 + NUM_CLASSES     # 50
ROWS_PAD = ((ROWS + 7) // 8) * 8                                   # 56
PW = ((max(COL_W1, COL_W2, COL_FC1, COL_FC2) + 127) // 128) * 128  # 256


def cnn_kernel(x_ref, params_ref, out_ref):
    xc = x_ref[...]                                            # (C*H, N*W)
    P = params_ref[...]                                        # (ROWS_PAD, PW)
    w1 = P[ROW_W1:ROW_W1 + F, :COL_W1]                         # (F, 161)
    w2 = P[ROW_W2:ROW_W2 + F, :COL_W2]                         # (F, 81)
    fc1 = P[ROW_FC1:ROW_FC1 + HIDDEN, :COL_FC1]                # (HIDDEN, 65)
    fc2 = P[ROW_FC2:ROW_FC2 + NUM_CLASSES, :COL_FC2]           # (CLS, 33)

    # ---- layer1: Conv2d(C->F,(KH,KW1),VALID)+bias+ReLU as ONE im2col matmul
    # (bias folded: last weight column * appended ones row).
    p1 = jnp.concatenate([xc[:, kw:kw + WO1C] for kw in range(KW1)]
                         + [jnp.ones((1, WO1C), jnp.float32)], axis=0)  # (161,51)
    h1 = jnp.maximum(jnp.dot(w1, p1, preferred_element_type=jnp.float32), 0.0)

    # ---- pool1: MaxPool2d((1,3), stride 1) over width.
    q1 = jnp.maximum(jnp.maximum(h1[:, 0:WP1C], h1[:, 1:1 + WP1C]),
                     h1[:, 2:2 + WP1C])                        # (F, WP1C)

    # ---- layer2: Conv2d(F->F,(1,KW2))+bias+ReLU as ONE matmul, then pool.
    p2 = jnp.concatenate([q1[:, kw:kw + WO2C] for kw in range(KW2)]
                         + [jnp.ones((1, WO2C), jnp.float32)], axis=0)  # (81,40)
    h2 = jnp.maximum(jnp.dot(w2, p2, preferred_element_type=jnp.float32), 0.0)
    q2 = jnp.maximum(jnp.maximum(h2[:, 0:WP2C], h2[:, 1:1 + WP2C]),
                     h2[:, 2:2 + WP2C])                        # (F, WP2C)

    # ---- fc1+bias+ReLU: fc1 is a width-WP2 "conv" evaluated at column n*W of
    # each sample -> shifted-slab trick again.  fc1 weight was pre-permuted to
    # column order (w, f) wrapper-side.
    p3 = jnp.concatenate([q2[:, w:w + SPAN] for w in range(WP2)]
                         + [jnp.ones((1, SPAN), jnp.float32)], axis=0)  # (65,31)
    h3 = jnp.maximum(jnp.dot(fc1, p3, preferred_element_type=jnp.float32), 0.0)

    # ---- fc2+bias + sigmoid; emit the full dense (NUM_CLASSES, SPAN) slab.
    # Per-sample column pick (columns n*W) happens in the wrapper.
    h3b = jnp.concatenate([h3, jnp.ones((1, SPAN), jnp.float32)], axis=0)  # (33,31)
    logits = jnp.dot(fc2, h3b, preferred_element_type=jnp.float32)
    out_ref[...] = 1.0 / (1.0 + jnp.exp(-logits))              # (CLS, SPAN)


_COST = pl.CostEstimate(
    flops=2 * (F * COL_W1 * WO1C + F * COL_W2 * WO2C
               + HIDDEN * COL_FC1 * SPAN + NUM_CLASSES * COL_FC2 * SPAN),
    transcendentals=NUM_CLASSES * SPAN,
    bytes_accessed=4 * (C * H * N * W + ROWS_PAD * PW + NUM_CLASSES * SPAN),
)


def pack_params(params):
    """One-time (cold-path) packing of all weights/biases into a single slab."""
    w1, b1, w2, b2, fc1w, fc1b, fc2w, fc2b = params
    # w1: (F,C,KH,KW1) -> (F, KW1*C*KH), matching im2col row order (kw, c, h).
    w1m = jnp.transpose(w1, (0, 3, 1, 2)).reshape(F, KW1 * C * KH)
    # w2: (F,F,1,KW2) -> (F, KW2*F), matching im2col row order (kw, g).
    w2m = jnp.transpose(w2[:, :, 0, :], (0, 2, 1)).reshape(F, KW2 * F)
    # fc1: PyTorch flatten order (f, w) -> column order (w, f).
    fc1m = jnp.transpose(fc1w.reshape(HIDDEN, F, WP2),
                         (0, 2, 1)).reshape(HIDDEN, WP2 * F)

    def block(mat, bias, width):
        blk = jnp.concatenate([mat, bias[:, None]], axis=1)    # fold bias column
        return jnp.pad(blk, ((0, 0), (0, PW - width)))

    slab = jnp.concatenate([
        block(w1m, b1, COL_W1),
        block(w2m, b2, COL_W2),
        block(fc1m, fc1b, COL_FC1),
        block(fc2w, fc2b, COL_FC2),
    ], axis=0)                                                 # (ROWS, PW)
    return jnp.pad(slab, ((0, ROWS_PAD - ROWS), (0, 0))).astype(jnp.float32)


@jax.jit
def cnn_forward(x_nchw, packed_params):
    """PyTorch-NCHW input + packed param slab -> (N, NUM_CLASSES) sigmoid probs."""
    # Glue: layout plumbing only.  x: (N,C,H,W) -> (C*H, N*W), batch in lanes.
    x_cat = jnp.transpose(x_nchw, (1, 2, 0, 3)).reshape(C * H, N * W)

    # Whole problem is a few KB -> single gridless program, full-extent VMEM
    # blocks, exactly 2 operand DMAs (x + params), zero grid bookkeeping.
    probs = pl.pallas_call(
        cnn_kernel,
        out_shape=jax.ShapeDtypeStruct((NUM_CLASSES, SPAN), jnp.float32),
        cost_estimate=_COST,
    )(x_cat, packed_params)

    # Pick each sample's valid column n*W (pure layout plumbing).
    return probs[:, ::W].T                                     # (N, NUM_CLASSES)


def ref_forward(x, params):
    """Pure-JAX reference mirroring the PyTorch forward exactly."""
    w1, b1, w2, b2, fc1w, fc1b, fc2w, fc2b = params
    dn = ('NCHW', 'OIHW', 'NCHW')
    y = lax.conv_general_dilated(x, w1, (1, 1), 'VALID', dimension_numbers=dn)
    y = jnp.maximum(y + b1[None, :, None, None], 0.0)
    y = lax.reduce_window(y, -jnp.inf, lax.max, (1, 1, 1, POOL), (1, 1, 1, 1), 'VALID')
    y = lax.conv_general_dilated(y, w2, (1, 1), 'VALID', dimension_numbers=dn)
    y = jnp.maximum(y + b2[None, :, None, None], 0.0)
    y = lax.reduce_window(y, -jnp.inf, lax.max, (1, 1, 1, POOL), (1, 1, 1, 1), 'VALID')
    y = y.reshape(y.shape[0], -1)
    y = jnp.maximum(y @ fc1w.T + fc1b, 0.0)
    y = y @ fc2w.T + fc2b
    return 1.0 / (1.0 + jnp.exp(-y))


def make_params(key):
    ks = jax.random.split(key, 8)
    w1 = jax.random.normal(ks[0], (F, C, KH, KW1), jnp.float32) * 0.1
    b1 = jax.random.normal(ks[1], (F,), jnp.float32) * 0.1
    w2 = jax.random.normal(ks[2], (F, F, 1, KW2), jnp.float32) * 0.1
    b2 = jax.random.normal(ks[3], (F,), jnp.float32) * 0.1
    fc1w = jax.random.normal(ks[4], (HIDDEN, FC1_IN), jnp.float32) * 0.1
    fc1b = jax.random.normal(ks[5], (HIDDEN,), jnp.float32) * 0.1
    fc2w = jax.random.normal(ks[6], (NUM_CLASSES, HIDDEN), jnp.float32) * 0.1
    fc2b = jax.random.normal(ks[7], (NUM_CLASSES,), jnp.float32) * 0.1
    return (w1, b1, w2, b2, fc1w, fc1b, fc2w, fc2b)


if __name__ == "__main__":
    key = jax.random.PRNGKey(0)
    kx, kp = jax.random.split(key)
    x = jax.random.normal(kx, (N, C, H, W), jnp.float32)
    params = make_params(kp)

    packed = jax.block_until_ready(pack_params(params))  # one-time, cold path
    out = jax.block_until_ready(cnn_forward(x, packed))

    ref = ref_forward(x, params)
    np.testing.assert_allclose(np.asarray(out), np.asarray(ref),
                               rtol=1e-4, atol=1e-4)
    print("KERNEL_OK")
</pallas_src>

<mosaic_0001>
module attributes {stable_mosaic.version = 11 : i64} {
  func.func @cnn_kernel(%arg0: memref<16x60xf32, #tpu.memory_space<vmem>>, %arg1: memref<56x256xf32, #tpu.memory_space<vmem>>, %arg2: memref<2x31xf32, #tpu.memory_space<vmem>>) attributes {dimension_semantics = [], scalar_prefetch = 0 : i64, scratch_operands = 0 : i64, tpu.core_type = #tpu.core_type<tc>} {
    %c0 = arith.constant 0 : index
    %c0_0 = arith.constant 0 : index
    %0 = vector.load %arg0[%c0, %c0_0] : memref<16x60xf32, #tpu.memory_space<vmem>>, vector<16x60xf32>
    %c0_1 = arith.constant 0 : index
    %c0_2 = arith.constant 0 : index
    %1 = vector.load %arg1[%c0_1, %c0_2] : memref<56x256xf32, #tpu.memory_space<vmem>>, vector<56x256xf32>
    %2 = vector.extract_strided_slice %1 {offsets = [0, 0], sizes = [8, 161], strides = [1, 1]} : vector<56x256xf32> to vector<8x161xf32>
    %3 = vector.extract_strided_slice %1 {offsets = [8, 0], sizes = [8, 81], strides = [1, 1]} : vector<56x256xf32> to vector<8x81xf32>
    %4 = vector.extract_strided_slice %1 {offsets = [16, 0], sizes = [32, 65], strides = [1, 1]} : vector<56x256xf32> to vector<32x65xf32>
    %5 = vector.extract_strided_slice %1 {offsets = [48, 0], sizes = [2, 33], strides = [1, 1]} : vector<56x256xf32> to vector<2x33xf32>
    %6 = vector.extract_strided_slice %0 {offsets = [0, 0], sizes = [16, 51], strides = [1, 1]} : vector<16x60xf32> to vector<16x51xf32>
    %7 = vector.extract_strided_slice %0 {offsets = [0, 1], sizes = [16, 51], strides = [1, 1]} : vector<16x60xf32> to vector<16x51xf32>
    %8 = vector.extract_strided_slice %0 {offsets = [0, 2], sizes = [16, 51], strides = [1, 1]} : vector<16x60xf32> to vector<16x51xf32>
    %9 = vector.extract_strided_slice %0 {offsets = [0, 3], sizes = [16, 51], strides = [1, 1]} : vector<16x60xf32> to vector<16x51xf32>
    %10 = vector.extract_strided_slice %0 {offsets = [0, 4], sizes = [16, 51], strides = [1, 1]} : vector<16x60xf32> to vector<16x51xf32>
    %11 = vector.extract_strided_slice %0 {offsets = [0, 5], sizes = [16, 51], strides = [1, 1]} : vector<16x60xf32> to vector<16x51xf32>
    %12 = vector.extract_strided_slice %0 {offsets = [0, 6], sizes = [16, 51], strides = [1, 1]} : vector<16x60xf32> to vector<16x51xf32>
    %13 = vector.extract_strided_slice %0 {offsets = [0, 7], sizes = [16, 51], strides = [1, 1]} : vector<16x60xf32> to vector<16x51xf32>
    %14 = vector.extract_strided_slice %0 {offsets = [0, 8], sizes = [16, 51], strides = [1, 1]} : vector<16x60xf32> to vector<16x51xf32>
    %15 = vector.extract_strided_slice %0 {offsets = [0, 9], sizes = [16, 51], strides = [1, 1]} : vector<16x60xf32> to vector<16x51xf32>
    %cst = arith.constant 1.000000e+00 : f32
    %16 = vector.broadcast %cst : f32 to vector<1x51xf32>
    %17 = tpu.concatenate %6, %7, %8, %9, %10, %11, %12, %13, %14, %15, %16 in 0 : vector<16x51xf32>, vector<16x51xf32>, vector<16x51xf32>, vector<16x51xf32>, vector<16x51xf32>, vector<16x51xf32>, vector<16x51xf32>, vector<16x51xf32>, vector<16x51xf32>, vector<16x51xf32>, vector<1x51xf32> -> vector<161x51xf32>
    %cst_3 = arith.constant dense<0.000000e+00> : vector<8x51xf32>
    %18 = tpu.matmul %2, %17, %cst_3 {dimension_numbers = #tpu.dot_dimension_numbers<[1], [0], [0], [1], [0, 0, 1, 1], [], []>} : vector<8x161xf32>, vector<161x51xf32>, vector<8x51xf32> -> vector<8x51xf32>
    %cst_4 = arith.constant 0.000000e+00 : f32
    %19 = vector.broadcast %cst_4 : f32 to vector<8x51xf32>
    %20 = arith.maximumf %18, %19 : vector<8x51xf32>
    %21 = vector.extract_strided_slice %20 {offsets = [0, 0], sizes = [8, 49], strides = [1, 1]} : vector<8x51xf32> to vector<8x49xf32>
    %22 = vector.extract_strided_slice %20 {offsets = [0, 1], sizes = [8, 49], strides = [1, 1]} : vector<8x51xf32> to vector<8x49xf32>
    %23 = arith.maximumf %21, %22 : vector<8x49xf32>
    %24 = vector.extract_strided_slice %20 {offsets = [0, 2], sizes = [8, 49], strides = [1, 1]} : vector<8x51xf32> to vector<8x49xf32>
    %25 = arith.maximumf %23, %24 : vector<8x49xf32>
    %26 = vector.extract_strided_slice %25 {offsets = [0, 0], sizes = [8, 40], strides = [1, 1]} : vector<8x49xf32> to vector<8x40xf32>
    %27 = vector.extract_strided_slice %25 {offsets = [0, 1], sizes = [8, 40], strides = [1, 1]} : vector<8x49xf32> to vector<8x40xf32>
    %28 = vector.extract_strided_slice %25 {offsets = [0, 2], sizes = [8, 40], strides = [1, 1]} : vector<8x49xf32> to vector<8x40xf32>
    %29 = vector.extract_strided_slice %25 {offsets = [0, 3], sizes = [8, 40], strides = [1, 1]} : vector<8x49xf32> to vector<8x40xf32>
    %30 = vector.extract_strided_slice %25 {offsets = [0, 4], sizes = [8, 40], strides = [1, 1]} : vector<8x49xf32> to vector<8x40xf32>
    %31 = vector.extract_strided_slice %25 {offsets = [0, 5], sizes = [8, 40], strides = [1, 1]} : vector<8x49xf32> to vector<8x40xf32>
    %32 = vector.extract_strided_slice %25 {offsets = [0, 6], sizes = [8, 40], strides = [1, 1]} : vector<8x49xf32> to vector<8x40xf32>
    %33 = vector.extract_strided_slice %25 {offsets = [0, 7], sizes = [8, 40], strides = [1, 1]} : vector<8x49xf32> to vector<8x40xf32>
    %34 = vector.extract_strided_slice %25 {offsets = [0, 8], sizes = [8, 40], strides = [1, 1]} : vector<8x49xf32> to vector<8x40xf32>
    %35 = vector.extract_strided_slice %25 {offsets = [0, 9], sizes = [8, 40], strides = [1, 1]} : vector<8x49xf32> to vector<8x40xf32>
    %cst_5 = arith.constant 1.000000e+00 : f32
    %36 = vector.broadcast %cst_5 : f32 to vector<1x40xf32>
    %37 = tpu.concatenate %26, %27, %28, %29, %30, %31, %32, %33, %34, %35, %36 in 0 : vector<8x40xf32>, vector<8x40xf32>, vector<8x40xf32>, vector<8x40xf32>, vector<8x40xf32>, vector<8x40xf32>, vector<8x40xf32>, vector<8x40xf32>, vector<8x40xf32>, vector<8x40xf32>, vector<1x40xf32> -> vector<81x40xf32>
    %cst_6 = arith.constant dense<0.000000e+00> : vector<8x40xf32>
    %38 = tpu.matmul %3, %37, %cst_6 {dimension_numbers = #tpu.dot_dimension_numbers<[1], [0], [0], [1], [0, 0, 1, 1], [], []>} : vector<8x81xf32>, vector<81x40xf32>, vector<8x40xf32> -> vector<8x40xf32>
    %cst_7 = arith.constant 0.000000e+00 : f32
    %39 = vector.broadcast %cst_7 : f32 to vector<8x40xf32>
    %40 = arith.maximumf %38, %39 : vector<8x40xf32>
    %41 = vector.extract_strided_slice %40 {offsets = [0, 0], sizes = [8, 38], strides = [1, 1]} : vector<8x40xf32> to vector<8x38xf32>
    %42 = vector.extract_strided_slice %40 {offsets = [0, 1], sizes = [8, 38], strides = [1, 1]} : vector<8x40xf32> to vector<8x38xf32>
    %43 = arith.maximumf %41, %42 : vector<8x38xf32>
    %44 = vector.extract_strided_slice %40 {offsets = [0, 2], sizes = [8, 38], strides = [1, 1]} : vector<8x40xf32> to vector<8x38xf32>
    %45 = arith.maximumf %43, %44 : vector<8x38xf32>
    %46 = vector.extract_strided_slice %45 {offsets = [0, 0], sizes = [8, 31], strides = [1, 1]} : vector<8x38xf32> to vector<8x31xf32>
    %47 = vector.extract_strided_slice %45 {offsets = [0, 1], sizes = [8, 31], strides = [1, 1]} : vector<8x38xf32> to vector<8x31xf32>
    %48 = vector.extract_strided_slice %45 {offsets = [0, 2], sizes = [8, 31], strides = [1, 1]} : vector<8x38xf32> to vector<8x31xf32>
    %49 = vector.extract_strided_slice %45 {offsets = [0, 3], sizes = [8, 31], strides = [1, 1]} : vector<8x38xf32> to vector<8x31xf32>
    %50 = vector.extract_strided_slice %45 {offsets = [0, 4], sizes = [8, 31], strides = [1, 1]} : vector<8x38xf32> to vector<8x31xf32>
    %51 = vector.extract_strided_slice %45 {offsets = [0, 5], sizes = [8, 31], strides = [1, 1]} : vector<8x38xf32> to vector<8x31xf32>
    %52 = vector.extract_strided_slice %45 {offsets = [0, 6], sizes = [8, 31], strides = [1, 1]} : vector<8x38xf32> to vector<8x31xf32>
    %53 = vector.extract_strided_slice %45 {offsets = [0, 7], sizes = [8, 31], strides = [1, 1]} : vector<8x38xf32> to vector<8x31xf32>
    %cst_8 = arith.constant 1.000000e+00 : f32
    %54 = vector.broadcast %cst_8 : f32 to vector<1x31xf32>
    %55 = tpu.concatenate %46, %47, %48, %49, %50, %51, %52, %53, %54 in 0 : vector<8x31xf32>, vector<8x31xf32>, vector<8x31xf32>, vector<8x31xf32>, vector<8x31xf32>, vector<8x31xf32>, vector<8x31xf32>, vector<8x31xf32>, vector<1x31xf32> -> vector<65x31xf32>
    %cst_9 = arith.constant dense<0.000000e+00> : vector<32x31xf32>
    %56 = tpu.matmul %4, %55, %cst_9 {dimension_numbers = #tpu.dot_dimension_numbers<[1], [0], [0], [1], [0, 0, 1, 1], [], []>} : vector<32x65xf32>, vector<65x31xf32>, vector<32x31xf32> -> vector<32x31xf32>
    %cst_10 = arith.constant 0.000000e+00 : f32
    %57 = vector.broadcast %cst_10 : f32 to vector<32x31xf32>
    %58 = arith.maximumf %56, %57 : vector<32x31xf32>
    %cst_11 = arith.constant 1.000000e+00 : f32
    %59 = vector.broadcast %cst_11 : f32 to vector<1x31xf32>
    %60 = tpu.concatenate %58, %59 in 0 : vector<32x31xf32>, vector<1x31xf32> -> vector<33x31xf32>
    %cst_12 = arith.constant dense<0.000000e+00> : vector<2x31xf32>
    %61 = tpu.matmul %5, %60, %cst_12 {dimension_numbers = #tpu.dot_dimension_numbers<[1], [0], [0], [1], [0, 0, 1, 1], [], []>} : vector<2x33xf32>, vector<33x31xf32>, vector<2x31xf32> -> vector<2x31xf32>
    %cst_13 = arith.constant 0.000000e+00 : f32
    %62 = vector.broadcast %cst_13 : f32 to vector<2x31xf32>
    %63 = arith.subf %62, %61 : vector<2x31xf32>
    %64 = math.exp %63 : vector<2x31xf32>
    %cst_14 = arith.constant 1.000000e+00 : f32
    %65 = vector.broadcast %cst_14 : f32 to vector<2x31xf32>
    %66 = arith.addf %65, %64 : vector<2x31xf32>
    %cst_15 = arith.constant 1.000000e+00 : f32
    %67 = vector.broadcast %cst_15 : f32 to vector<2x31xf32>
    %68 = arith.divf %67, %66 : vector<2x31xf32>
    %c0_16 = arith.constant 0 : index
    %c0_17 = arith.constant 0 : index
    %69 = vector.load %arg2[%c0_16, %c0_17] : memref<2x31xf32, #tpu.memory_space<vmem>>, vector<2x31xf32>
    tpu.vector_store %arg2[%c0_16, %c0_17], %68 {strides = array<i32>} : memref<2x31xf32, #tpu.memory_space<vmem>>, vector<2x31xf32>,
    return
  }
}

</mosaic_0001>

<bundles_post_ra>
// kernel: cnn_forward.1
= control target key start
LH: loop header
LB: loop body
LE: loop exit
PB: predicated region body
PF: predicated region fallthrough
CT: control target
= control target key end

     0   :  { %v719_v2 = vmov 0.0|0.0   ;;  %s720_s13 = smov 127   ;;  %s721_s14 = smov 125   ;;  %vm77_vm0 = vcmask 269312   ;;  %v729_v42 = vmov 0.0   ;;  %vm81_vm1 = vcmask 1040384   ;;  %s849_s0 = inlined_call_operand.vmem [shape: f32[16,60], index: 0, kind: input, shape index: {}]   ;;  %s850_s1 = inlined_call_operand.vmem [shape: f32[56,256], index: 1, kind: input, shape index: {}]   ;;  %s851_s2 = inlined_call_operand.vmem [shape: f32[2,31], index: 2, kind: output, shape index: {}]  }
   0x1   :  { %v11_v0 = vld [vmem:[%s849_s0] sm:$0xff]  ;;  %v12_v1 = vld [vmem:[%s849_s0 + $0x8] sm:$0xff]  ;;  %590 = vmatprep.subr.bf16.mxu0 %v719_v2  ;;  %620 = vmatprep.subr.bf16.mxu1 %v719_v2  ;;  %s722_s15 = smov 126   ;;  %s723_s0 = smov 124   ;;  %v730_v44 = vmov 1.0   ;;  %vm731_vm2 = vmmov 0  }
   0x2   :  { %v670_v3 = vpack.i.bf16 %v12_v1, %v11_v0  ;;  %v591_v4 = vpack.c.bf16 %v12_v1, %v11_v0  ;;  %s724_s16 = smov 123   ;;  %s725_s17 = smov 122   ;;  %v14_v5 = vld [vmem:[%s850_s1 + $0x8] sm:$0xff]  ;;  %v13_v43 = vld [vmem:[%s850_s1] sm:$0xff]  ;;  %550 = vmatprep.mubr.msk.f32.mxu1 %vm731_vm2, %v729_v42  ;;  %vm193_vm3 = vcmask 662528   ;;  %vm299_vm4 = vcmask 531456  }
   0x3   :  { %s726_s18 = smov 121   ;;  %s727_s19 = smov 120   ;;  %487 = vmatprep.mubr.msk.f32.mxu0 %vm77_vm0, %v14_v5  ;;  %vm480_vm5 = vcmask 246784  }
   0x4   :  { %671 = vrot.lane.b32.xlu0 %v670_v3, %s720_s13  ;;  %681 = vrot.lane.b32.xlu1 %v670_v3, %s721_s14  ;;  %s728_s20 = smov 119  }
   0x5   :  { %592 = vmatpush1.bf16.msra.mxu0 %v591_v4 }
   0x6   :  { %593 = vmatprep.subr.bf16.mxu0 %v719_v2 }
   0x8   :  { %676 = vrot.lane.b32.xlu0 %v670_v3, %s722_s15  ;;  %686 = vrot.lane.b32.xlu1 %v670_v3, %s723_s0 }
   0xc   :  { %691 = vrot.lane.b32.xlu0 %v670_v3, %s724_s16  ;;  %696 = vrot.lane.b32.xlu1 %v670_v3, %s725_s17 }
  0x10   :  { %701 = vrot.lane.b32.xlu0 %v670_v3, %s726_s18  ;;  %706 = vrot.lane.b32.xlu1 %v670_v3, %s727_s19 }
  0x14   :  { %711 = vrot.lane.b32.xlu0 %v670_v3, %s728_s20  ;;  %v15_v3 = vld [vmem:[%s850_s1 + $0x10] sm:$0xff] }
  0x76   :  { %v672_v6 = vpop.permute.xlu0 %671  ;;  %v682_v7 = vpop.permute.xlu1 %681 }
  0x77   :  { %v674_v8 = vunpack.i.h.bf16 %v672_v6  ;;  %v673_v9 = vunpack.i.l.bf16 %v672_v6  ;;  %v684_v14 = vunpack.i.h.bf16 %v682_v7  ;;  %v683_v15 = vunpack.i.l.bf16 %v682_v7 }
  0x79   :  { %v594_v10 = vpack.c.bf16 %v674_v8, %v673_v9  ;;  %v600_v18 = vpack.c.bf16 %v684_v14, %v683_v15 }
  0x7a   :  { %v677_v11 = vpop.permute.xlu0 %676  ;;  %v687_v16 = vpop.permute.xlu1 %686 }
  0x7b   :  { %v679_v12 = vunpack.i.h.bf16 %v677_v11  ;;  %v678_v13 = vunpack.i.l.bf16 %v677_v11  ;;  %595 = vmatpush1.bf16.msra.mxu0 %v594_v10  ;;  %v689_v19 = vunpack.i.h.bf16 %v687_v16  ;;  %v688_v20 = vunpack.i.l.bf16 %v687_v16  ;;  %v16_v11 = vld [vmem:[%s850_s1 + $0x20] sm:$0xff] }
  0x7c   :  { %596 = vmatprep.subr.bf16.mxu0 %v719_v2 }
  0x7d   :  { %v597_v17 = vpack.c.bf16 %v679_v12, %v678_v13  ;;  %v603_v22 = vpack.c.bf16 %v689_v19, %v688_v20 }
  0x7e   :  { %v692_v21 = vpop.permute.xlu0 %691  ;;  %v697_v25 = vpop.permute.xlu1 %696 }
  0x7f   :  { %598 = vmatpush1.bf16.msra.mxu0 %v597_v17  ;;  %v694_v23 = vunpack.i.h.bf16 %v692_v21  ;;  %v693_v24 = vunpack.i.l.bf16 %v692_v21  ;;  %v699_v27 = vunpack.i.h.bf16 %v697_v25  ;;  %v698_v28 = vunpack.i.l.bf16 %v697_v25  ;;  %v19_v25 = vld [vmem:[%s850_s1 + $0x50] sm:$0xff] }
  0x80   :  { %599 = vmatprep.subr.bf16.mxu0 %v719_v2 }
  0x81   :  { %v606_v26 = vpack.c.bf16 %v694_v23, %v693_v24  ;;  %v609_v30 = vpack.c.bf16 %v699_v27, %v698_v28  ;;  %v17_v23 = vld [vmem:[%s850_s1 + $0x30] sm:$0xff]  ;;  %v18_v24 = vld [vmem:[%s850_s1 + $0x40] sm:$0xff] }
  0x82   :  { %v702_v29 = vpop.permute.xlu0 %701  ;;  %v707_v33 = vpop.permute.xlu1 %706 }
  0x83   :  { %601 = vmatpush1.bf16.msra.mxu0 %v600_v18  ;;  %v704_v31 = vunpack.i.h.bf16 %v702_v29  ;;  %v703_v32 = vunpack.i.l.bf16 %v702_v29  ;;  %v709_v35 = vunpack.i.h.bf16 %v707_v33  ;;  %v708_v36 = vunpack.i.l.bf16 %v707_v33 }
  0x84   :  { %602 = vmatprep.subr.bf16.mxu0 %v719_v2 }
  0x85   :  { %v612_v34 = vpack.c.bf16 %v704_v31, %v703_v32  ;;  %v615_v38 = vpack.c.bf16 %v709_v35, %v708_v36  ;;  %v20_v36 = vld [vmem:[%s850_s1 + $0x60] sm:$0xff] }
  0x86   :  { %v712_v37 = vpop.permute.xlu0 %711 }
  0x87   :  { %604 = vmatpush1.bf16.msra.mxu0 %v603_v22  ;;  %v714_v39 = vunpack.i.h.bf16 %v712_v37  ;;  %v713_v40 = vunpack.i.l.bf16 %v712_v37 }
  0x88   :  { %605 = vmatprep.subr.bf16.mxu0 %v719_v2 }
  0x89   :  { %v618_v41 = vpack.c.bf16 %v714_v39, %v713_v40 }
  0x8b   :  { %607 = vmatpush1.bf16.msra.mxu0 %v606_v26 }
  0x8c   :  { %608 = vmatprep.subr.bf16.mxu0 %v719_v2 }
  0x8f   :  { %610 = vmatpush1.bf16.msra.mxu0 %v609_v30 }
  0x90   :  { %611 = vmatprep.subr.bf16.mxu0 %v719_v2 }
  0x93   :  { %613 = vmatpush1.bf16.msra.mxu0 %v612_v34 }
  0x94   :  { %614 = vmatprep.subr.bf16.mxu0 %v719_v2 }
  0x97   :  { %616 = vmatpush1.bf16.msra.mxu0 %v615_v38 }
  0x98   :  { %617 = vmatprep.subr.bf16.mxu0 %v719_v2 }
  0x9b   :  { %619 = vmatpush1.bf16.msra.mxu0 %v618_v41 }
  0x9c   :  { %125 = vmatprep.subr.mxu0 %v729_v42 }
  0x9f   :  { %486 = vmatpush1.msk.msra.mxu0 %vm81_vm1, %v730_v44 }
  0xa0   :  { %150 = vmatmul.mubr.f32.vlgmr.msra.gmra.mrb[0].mxu0 %v13_v43 }
 0x173   :  { %v151_v45 = vpop.f32.mrb[0].mxu0 }
 0x174   :  { %v155_v46 = vmax.f32 %v151_v45, 0.0  ;;  %v153_v47 = vpop.f32.mrb[1].mxu0 }
 0x176   :  { %161 = vrot.lane.b32.xlu0 %v155_v46, %s722_s15  ;;  %157 = vrot.lane.b32.xlu1 %v155_v46, %s720_s13 }
 0x1e8   :  { %v158_v48 = vpop.permute.xlu1 %157  ;;  %v162_v50 = vpop.permute.xlu0 %161 }
 0x1e9   :  { %v160_v49 = vmax.f32 %v155_v46, %v158_v48 }
 0x1eb   :  { %v164_v51 = vmax.f32 %v160_v49, %v162_v50 }
 0x1ed   :  { %169 = vrot.lane.b32.xlu0 %v164_v51, %s722_s15  ;;  %166 = vrot.lane.b32.xlu1 %v164_v51, %s720_s13 }
 0x1f1   :  { %175 = vrot.lane.b32.xlu0 %v164_v51, %s723_s0  ;;  %172 = vrot.lane.b32.xlu1 %v164_v51, %s721_s14 }
 0x1f5   :  { %181 = vrot.lane.b32.xlu0 %v164_v51, %s725_s17  ;;  %178 = vrot.lane.b32.xlu1 %v164_v51, %s724_s16 }
 0x1f9   :  { %187 = vrot.lane.b32.xlu0 %v164_v51, %s727_s19  ;;  %184 = vrot.lane.b32.xlu1 %v164_v51, %s726_s18 }
 0x1fd   :  { %190 = vrot.lane.b32.xlu1 %v164_v51, %s728_s20 }
 0x25f   :  { %v170_v52 = vpop.permute.xlu0 %169  ;;  %v167_v53 = vpop.permute.xlu1 %166 }
 0x260   :  { %v621_v54 = vpack.c.bf16 %v167_v53, %v164_v51 }
 0x262   :  { %622 = vmatpush3.bf16.msra.mxu1 %v621_v54 }
 0x263   :  { %v176_v55 = vpop.permute.xlu0 %175  ;;  %v173_v56 = vpop.permute.xlu1 %172  ;;  %623 = vmatprep.subr.bf16.mxu1 %v719_v2 }
 0x264   :  { %v624_v57 = vpack.c.bf16 %v173_v56, %v170_v52 }
 0x266   :  { %625 = vmatpush3.bf16.msra.mxu1 %v624_v57 }
 0x267   :  { %v179_v58 = vpop.permute.xlu1 %178  ;;  %626 = vmatprep.subr.bf16.mxu1 %v719_v2  ;;  %v182_v60 = vpop.permute.xlu0 %181 }
 0x268   :  { %v627_v59 = vpack.c.bf16 %v179_v58, %v176_v55 }
 0x26a   :  { %628 = vmatpush3.bf16.msra.mxu1 %v627_v59 }
 0x26b   :  { %v185_v61 = vpop.permute.xlu1 %184  ;;  %629 = vmatprep.subr.bf16.mxu1 %v719_v2  ;;  %v188_v63 = vpop.permute.xlu0 %187 }
 0x26c   :  { %v630_v62 = vpack.c.bf16 %v185_v61, %v182_v60 }
 0x26e   :  { %631 = vmatpush3.bf16.msra.mxu1 %v630_v62 }
 0x26f   :  { %v191_v0 = vpop.permute.xlu1 %190  ;;  %632 = vmatprep.subr.bf16.mxu1 %v719_v2 }
 0x270   :  { %v633_v1 = vpack.c.bf16 %v191_v0, %v188_v63 }
 0x272   :  { %634 = vmatpush3.bf16.msra.mxu1 %v633_v1 }
 0x273   :  { %548 = vmatprep.subr.mxu1 %v729_v42 }
 0x276   :  { %549 = vmatpush3.msk.msra.mxu1 %vm81_vm1, %v730_v44 }
 0x277   :  { %551 = vmatmul.mubr.msk.f32.vlgmr.msra.gmra.mrb[0].mxu1 %vm193_vm3, %v15_v3 }
 0x278   :  { %571 = vmatprep.mubr.msk.f32.mxu1 %vm299_vm4, %v16_v11 }
 0x34a   :  { %v263_v4 = vpop.f32.mrb[0].mxu1 }
 0x34b   :  { %v267_v5 = vmax.f32 %v263_v4, 0.0  ;;  %v552_v6 = vpop.f32.mrb[1].mxu1 }
 0x34d   :  { %273 = vrot.lane.b32.xlu1 %v267_v5, %s722_s15  ;;  %269 = vrot.lane.b32.xlu0 %v267_v5, %s720_s13 }
 0x3bf   :  { %v270_v7 = vpop.permute.xlu0 %269  ;;  %v274_v9 = vpop.permute.xlu1 %273 }
 0x3c0   :  { %v272_v8 = vmax.f32 %v267_v5, %v270_v7 }
 0x3c2   :  { %v276_v10 = vmax.f32 %v272_v8, %v274_v9 }
 0x3c4   :  { %281 = vrot.lane.b32.xlu1 %v276_v10, %s722_s15  ;;  %278 = vrot.lane.b32.xlu0 %v276_v10, %s720_s13 }
 0x3c8   :  { %287 = vrot.lane.b32.xlu1 %v276_v10, %s723_s0  ;;  %284 = vrot.lane.b32.xlu0 %v276_v10, %s721_s14 }
 0x3cc   :  { %293 = vrot.lane.b32.xlu1 %v276_v10, %s725_s17  ;;  %290 = vrot.lane.b32.xlu0 %v276_v10, %s724_s16 }
 0x3d0   :  { %296 = vrot.lane.b32.xlu0 %v276_v10, %s726_s18 }
 0x436   :  { %v282_v12 = vpop.permute.xlu1 %281  ;;  %v279_v13 = vpop.permute.xlu0 %278 }
 0x437   :  { %v635_v14 = vpack.c.bf16 %v279_v13, %v276_v10 }
 0x439   :  { %636 = vmatprep.subr.bf16.mxu1 %v635_v14 }
 0x43a   :  { %638 = vmatpush3.bf16.msra.mxu1 %v635_v14  ;;  %v285_v15 = vpop.permute.xlu0 %284  ;;  %v288_v17 = vpop.permute.xlu1 %287 }
 0x43b   :  { %v639_v16 = vpack.c.bf16 %v285_v15, %v282_v12 }
 0x43d   :  { %640 = vmatprep.subr.bf16.mxu1 %v639_v16 }
 0x43e   :  { %642 = vmatpush3.bf16.msra.mxu1 %v639_v16  ;;  %v291_v18 = vpop.permute.xlu0 %290  ;;  %v294_v20 = vpop.permute.xlu1 %293 }
 0x43f   :  { %v643_v19 = vpack.c.bf16 %v291_v18, %v288_v17 }
 0x441   :  { %644 = vmatprep.subr.bf16.mxu1 %v643_v19 }
 0x442   :  { %646 = vmatpush3.bf16.msra.mxu1 %v643_v19  ;;  %v297_v21 = vpop.permute.xlu0 %296 }
 0x443   :  { %v647_v22 = vpack.c.bf16 %v297_v21, %v294_v20 }
 0x445   :  { %648 = vmatprep.subr.bf16.mxu1 %v647_v22 }
 0x446   :  { %650 = vmatpush3.bf16.msra.mxu1 %v647_v22 }
 0x447   :  { %569 = vmatprep.subr.msk.mxu1 %vm81_vm1, %v730_v44 }
 0x44a   :  { %570 = vmatpush3.msk.msra.mxu1 %vm81_vm1, %v730_v44 }
 0x44b   :  { %572 = vmatmul.mubr.msk.f32.vlgmr.msra.gmra.mrb[2].mxu1 %vm299_vm4, %v17_v23  ;;  %651 = vmatprep.subr.bf16.mxu1 %v719_v2 }
 0x44c   :  { %574 = vmatprep.mubr.msk.f32.mxu1 %vm299_vm4, %v18_v24 }
 0x44f   :  { %575 = vmatmul.mubr.msk.f32.gmra.mrb[4].mxu1 %vm299_vm4, %v19_v25 }
 0x450   :  { %587 = vmatprep.mubr.msk.f32.mxu1 %vm731_vm2, %v729_v42 }
 0x51e   :  { %v573_v26 = vpop.f32.mrb[2].mxu1 }
 0x51f   :  { %v398_v27 = vmax.f32 %v573_v26, 0.0  ;;  %v378_v28 = vpop.f32.mrb[3].mxu1 }
 0x520   :  { %v397_v29 = vmax.f32 %v378_v28, 0.0 }
 0x522   :  { %v652_v30 = vpack.c.bf16 %v398_v27, %v397_v29  ;;  %v576_v31 = vpop.f32.mrb[4].mxu1 }
 0x523   :  { %v400_v32 = vmax.f32 %v576_v31, 0.0  ;;  %v388_v33 = vpop.f32.mrb[5].mxu1 }
 0x524   :  { %v399_v34 = vmax.f32 %v388_v33, 0.0  ;;  %653 = vmatpush3.bf16.msra.mxu1 %v652_v30 }
 0x525   :  { %654 = vmatprep.subr.bf16.mxu1 %v719_v2 }
 0x526   :  { %v655_v35 = vpack.c.bf16 %v400_v32, %v399_v34 }
 0x528   :  { %656 = vmatpush3.bf16.msra.mxu1 %v655_v35 }
 0x529   :  { %585 = vmatprep.subr.mxu1 %v729_v42 }
 0x52c   :  { %586 = vmatpush3.msk.msra.mxu1 %vm81_vm1, %v730_v44 }
 0x52d   :  { %588 = vmatmul.mubr.msk.f32.vlgmr.msra.gmra.mrb[6].mxu1 %vm77_vm0, %v20_v36 }
 0x600   :  { %v470_v37 = vpop.f32.mrb[6].mxu1 }
 0x601   :  { %v474_v38 = vsub.f32 0.0, %v470_v37  ;;  %v589_v39 = vpop.f32.mrb[7].mxu1 }
 0x603   :  { %v475_v40 = vmul.f32 1.442695, %v474_v38 }
 0x605   :  { %715 = vpow2.f32 %v475_v40 }
 0x60f   :  { %v716_v41 = vpop.eup %715 }
 0x610   :  { %v477_v2 = vadd.f32 1.0, %v716_v41 }
 0x612   :  { %717 = vrcp.f32 %v477_v2 }
 0x61c   :  { %v718_v43 = vpop.eup %717 }
 0x61d   :  { %481 = vst.msk [vmem:[%s851_s2] sm:$0x3] %vm480_vm5, %v718_v43 }

</bundles_post_ra>
